<compile_context>
chip_gen: v6e
topology: v6e:2x2x1
jax: 0.10.0
libtpu: 0.0.40
codegen_flags: <defaults>
</compile_context>

<pallas_src>
import jax
import jax.numpy as jnp
from jax.experimental import pallas as pl
from jax.experimental.pallas import tpu as pltpu


# --------------------------------------------------------------------------
# Kernel: one batch tile.   out = enc @ W_enc_T + (b0 + floor * (b1 - b0))
# --------------------------------------------------------------------------
def _abs_floor_emb_kernel(floors_ref, enc_ref, w_ref, bias2_ref, out_ref):
    enc = enc_ref[...]
    w = w_ref[...]
    if enc.dtype != w.dtype:
        # In-kernel cast (VPU) for the bf16 path -- never cast in the wrapper.
        enc = enc.astype(w.dtype)

    # MXU: (TB, D_in) @ (D_in, D_pad) with f32 accumulation.
    acc = jnp.dot(enc, w, preferred_element_type=jnp.float32)

    # VPU FMA epilogue: bias2 rows are [b0, b1 - b0]; floors are f32 0/1.
    fused_bias = bias2_ref[0:1, :] + floors_ref[...] * bias2_ref[1:2, :]

    out_ref[...] = (acc + fused_bias).astype(out_ref.dtype)


# --------------------------------------------------------------------------
# One-time parameter preparation (model prep, NOT in the per-call hot path).
# --------------------------------------------------------------------------
def prepare_params(emb_table, weight, bias, *, weight_dtype=None):
    """emb_table: (2, E), weight: (D, D+E) PyTorch Linear layout, bias: (D,).

    Returns:
      w_enc_t : (D, D_pad)  encoding half of the weight, pre-transposed to
                (in, out) and zero-padded so D_pad is a multiple of 128
                (lane-dense output stores).
      bias2   : (2, D_pad)  f32 rows [b0, b1 - b0] with
                b_f = emb_table[f] @ W_emb.T + bias.
    """
    d = weight.shape[0]
    d_pad = ((d + 127) // 128) * 128

    w_enc_t = jnp.asarray(weight[:, :d], dtype=jnp.float32).T        # (D_in, D_out)
    w_emb = jnp.asarray(weight[:, d:], dtype=jnp.float32)            # (D_out, E)

    b_rows = emb_table.astype(jnp.float32) @ w_emb.T + bias.astype(jnp.float32)[None, :]
    bias2 = jnp.stack([b_rows[0], b_rows[1] - b_rows[0]], axis=0)    # [b0, b1-b0]

    if d_pad != d:
        w_enc_t = jnp.pad(w_enc_t, ((0, 0), (0, d_pad - d)))
        bias2 = jnp.pad(bias2, ((0, 0), (0, d_pad - d)))

    if weight_dtype is not None:
        # e.g. bf16: halves resident VMEM + weight DMA (one-time cast, not per call).
        w_enc_t = w_enc_t.astype(weight_dtype)

    return w_enc_t, bias2


# --------------------------------------------------------------------------
# VMEM-aware batch-tile picker
# --------------------------------------------------------------------------
def _vmem_budget_bytes():
    try:
        phys = pltpu.get_tpu_info().vmem_capacity_bytes    # 128 MiB v5e/v6e, 64 MiB v7x
    except Exception:
        phys = 64 << 20                                    # conservative (v7x)
    # Leave headroom for compiler-internal scratch; cap near the usable ceiling.
    return min(max(phys - (16 << 20), 24 << 20), 100 << 20)


def _pick_batch_tile(b, per_row_bytes, vmem_free_bytes):
    """Largest multiple-of-8 tile dividing b that fits the streaming budget,
    preferring >=2 grid steps (feeds both v7x TensorCores)."""
    fitting = None
    for tb in (1024, 768, 512, 384, 256, 128, 64, 32, 16, 8):
        if tb > b or b % tb:
            continue
        if tb * per_row_bytes > vmem_free_bytes:
            continue
        if fitting is None:
            fitting = tb                 # largest fitting tile (may be single-step)
        if b // tb >= 2:
            return tb                    # largest fitting tile with >=2 grid steps
    if fitting is not None:
        return fitting
    # Tiny / ragged batch (or nothing fits): single full-batch block.  A block
    # equal to the full dim is layout-legal even when b is not a multiple of 8.
    return b


# --------------------------------------------------------------------------
# Wrapper
# --------------------------------------------------------------------------
def abs_floor_emb_encoder(encodings, src_floors, w_enc_t, bias2, *, out_dtype=None):
    """encodings: (B, D) , src_floors: (B,) int in {0,1},
    w_enc_t: (D, D_pad) from prepare_params, bias2: (2, D_pad) f32.

    out_dtype: set to jnp.bfloat16 to halve output HBM traffic if downstream
    tolerates it; defaults to the encoding dtype.
    """
    b, d_in = encodings.shape
    d_pad = w_enc_t.shape[1]
    d_out = d_in                                   # Linear(D+E, D): output dim == input_dim
    if out_dtype is None:
        out_dtype = encodings.dtype

    # floors as f32 multipliers for the FMA-style bias select (contract: 0/1).
    floors2d = src_floors.astype(jnp.float32).reshape(b, 1)

    enc_bytes = encodings.dtype.itemsize
    w_bytes = w_enc_t.dtype.itemsize
    out_bytes = jnp.dtype(out_dtype).itemsize

    # VMEM accounting (conservative: assume resident blocks are double-buffered).
    resident = 2 * (d_in * d_pad * w_bytes) + 2 * (2 * d_pad * 4)
    per_row = 2 * (d_in * enc_bytes + d_pad * out_bytes + 4)   # double-buffered streams
    budget = _vmem_budget_bytes()
    # TODO(synk): if the resident weight alone exceeds the budget (D >~ 3-4k f32 on
    # v7x), add a second grid axis over output columns with a (d_in, tn) weight
    # block instead of keeping the full weight resident.
    tb = _pick_batch_tile(b, per_row, max(budget - resident, 4 << 20))
    grid = (b // tb,)

    need = resident + tb * per_row + (1 << 20)
    compiler_kwargs = {}
    if need > (15 << 20):           # above the smallest default scoped limit (v5e)
        compiler_kwargs["vmem_limit_bytes"] = int(min(need * 5 // 4, budget))

    cost = pl.CostEstimate(
        flops=2 * b * d_in * d_pad,
        transcendentals=0,
        bytes_accessed=(b * d_in * enc_bytes + b * d_pad * out_bytes
                        + d_in * d_pad * w_bytes + b * 4 + 2 * d_pad * 4),
    )

    def _call(single_buffer_resident):
        resident_kwargs = (
            dict(pipeline_mode=pl.Buffered(1)) if single_buffer_resident else {}
        )
        grid_spec = pltpu.PrefetchScalarGridSpec(
            num_scalar_prefetch=0,
            grid=grid,
            in_specs=[
                pl.BlockSpec((tb, 1), lambda i: (i, 0)),        # floors (tiny)
                pl.BlockSpec((tb, d_in), lambda i: (i, 0)),     # encodings (pipelined)
                pl.BlockSpec((d_in, d_pad), lambda i: (0, 0),   # W_enc_T (VMEM-resident)
                             **resident_kwargs),
                pl.BlockSpec((2, d_pad), lambda i: (0, 0),      # fused bias rows (resident)
                             **resident_kwargs),
            ],
            out_specs=pl.BlockSpec((tb, d_pad), lambda i: (i, 0)),
        )
        return pl.pallas_call(
            _abs_floor_emb_kernel,
            out_shape=jax.ShapeDtypeStruct((b, d_pad), out_dtype),
            grid_spec=grid_spec,
            compiler_params=pltpu.CompilerParams(
                dimension_semantics=("parallel",), **compiler_kwargs),
            cost_estimate=cost,
        )(floors2d, encodings, w_enc_t, bias2)

    try:
        out_padded = _call(True)
    except Exception:
        # pl.Buffered(1) not accepted on this jax version -> default double-buffering
        # of the resident weight/bias blocks (correctness unchanged).
        out_padded = _call(False)

    return out_padded if d_pad == d_out else out_padded[:, :d_out]


# --------------------------------------------------------------------------
# Pure-JAX reference (mirrors the PyTorch forward)
# --------------------------------------------------------------------------
def reference(encodings, src_floors, emb_table, weight, bias):
    floor_emb = emb_table[src_floors]                       # (B, E)
    x = jnp.concatenate([encodings, floor_emb], axis=1)     # (B, D+E)
    return x @ weight.T + bias                              # (B, D)


if __name__ == "__main__":
    # Small shapes consistent with the module's forward.
    B, D, E = 8, 32, 16    # batch, input_dim, embedding_dim

    key = jax.random.PRNGKey(0)
    k_enc, k_floor, k_emb, k_w, k_b = jax.random.split(key, 5)

    encodings = jax.random.normal(k_enc, (B, D), dtype=jnp.float32)
    src_floors = jax.random.randint(k_floor, (B,), 0, 2, dtype=jnp.int32)

    # Deterministic synthetic parameters (mimicking init_module_weights gains).
    emb_table = 1.0 * jax.random.normal(k_emb, (2, E), dtype=jnp.float32)
    weight = 0.1 * jax.random.uniform(k_w, (D, D + E), dtype=jnp.float32,
                                      minval=-1.0, maxval=1.0)
    bias = 0.1 * jax.random.uniform(k_b, (D,), dtype=jnp.float32,
                                    minval=-1.0, maxval=1.0)

    # One-time prep: embedding folded into two bias rows, weight pre-transposed,
    # output lanes padded to a multiple of 128.  (Pass weight_dtype=jnp.bfloat16
    # for the bf16 path on v6e/v7x; f32 here keeps the correctness check tight.)
    w_enc_t, bias2 = prepare_params(emb_table, weight, bias)

    out = abs_floor_emb_encoder(encodings, src_floors, w_enc_t, bias2)
    out = jax.block_until_ready(out)

    ref = reference(encodings, src_floors, emb_table, weight, bias)
    assert out.shape == (B, D)
    assert jnp.allclose(out, ref, atol=1e-5, rtol=1e-5), "mismatch vs reference"

    print("KERNEL_OK")
</pallas_src>

<mosaic_0001>
module attributes {stable_mosaic.version = 11 : i64} {
  func.func @_abs_floor_emb_kernel(%arg0: i32, %arg1: memref<8x1xf32, #tpu.memory_space<vmem>>, %arg2: memref<8x32xf32, #tpu.memory_space<vmem>>, %arg3: memref<32x128xf32, #tpu.memory_space<vmem>>, %arg4: memref<2x128xf32, #tpu.memory_space<vmem>>, %arg5: memref<8x128xf32, #tpu.memory_space<vmem>>) attributes {dimension_semantics = [#tpu.dimension_semantics<parallel>], iteration_bounds = array<i64: 1>, scalar_prefetch = 0 : i64, scratch_operands = 0 : i64, tpu.core_type = #tpu.core_type<tc>, window_params = [{transform_indices = @transform_0, window_bounds = array<i64: 8, 1>}, {transform_indices = @transform_1, window_bounds = array<i64: 8, 32>}, {pipeline_mode = #tpu.pipeline_mode<synchronous>, transform_indices = @transform_2, window_bounds = array<i64: 32, 128>}, {pipeline_mode = #tpu.pipeline_mode<synchronous>, transform_indices = @transform_3, window_bounds = array<i64: 2, 128>}, {transform_indices = @transform_4, window_bounds = array<i64: 8, 128>}]} {
    %c0 = arith.constant 0 : index
    %c0_0 = arith.constant 0 : index
    %0 = vector.load %arg2[%c0, %c0_0] : memref<8x32xf32, #tpu.memory_space<vmem>>, vector<8x32xf32>
    %c0_1 = arith.constant 0 : index
    %c0_2 = arith.constant 0 : index
    %1 = vector.load %arg3[%c0_1, %c0_2] : memref<32x128xf32, #tpu.memory_space<vmem>>, vector<32x128xf32>
    %cst = arith.constant dense<0.000000e+00> : vector<8x128xf32>
    %2 = tpu.matmul %0, %1, %cst {dimension_numbers = #tpu.dot_dimension_numbers<[1], [0], [0], [1], [0, 0, 1, 1], [], []>} : vector<8x32xf32>, vector<32x128xf32>, vector<8x128xf32> -> vector<8x128xf32>
    %c0_3 = arith.constant 0 : index
    %c0_4 = arith.constant 0 : index
    %3 = vector.load %arg4[%c0_3, %c0_4] : memref<2x128xf32, #tpu.memory_space<vmem>>, vector<1x128xf32>
    %c0_5 = arith.constant 0 : index
    %c0_6 = arith.constant 0 : index
    %4 = vector.load %arg1[%c0_5, %c0_6] : memref<8x1xf32, #tpu.memory_space<vmem>>, vector<8x1xf32>
    %c1 = arith.constant 1 : index
    %c0_7 = arith.constant 0 : index
    %5 = vector.load %arg4[%c1, %c0_7] : memref<2x128xf32, #tpu.memory_space<vmem>>, vector<1x128xf32>
    %6 = vector.broadcast %4 : vector<8x1xf32> to vector<8x128xf32>
    %7 = vector.broadcast %5 : vector<1x128xf32> to vector<8x128xf32>
    %8 = arith.mulf %6, %7 : vector<8x128xf32>
    %9 = vector.broadcast %3 : vector<1x128xf32> to vector<8x128xf32>
    %10 = arith.addf %9, %8 : vector<8x128xf32>
    %11 = arith.addf %2, %10 : vector<8x128xf32>
    %c0_8 = arith.constant 0 : index
    %c0_9 = arith.constant 0 : index
    %12 = vector.load %arg5[%c0_8, %c0_9] : memref<8x128xf32, #tpu.memory_space<vmem>>, vector<8x128xf32>
    tpu.vector_store %arg5[%c0_8, %c0_9], %11 {strides = array<i32>} : memref<8x128xf32, #tpu.memory_space<vmem>>, vector<8x128xf32>,
    return
  }
  func.func @transform_0(%arg0: i32) -> (i32, i32) {
    %c0_i32 = arith.constant 0 : i32
    %c0_i32_0 = arith.constant 0 : i32
    return %arg0, %c0_i32 : i32, i32
  }
  func.func @transform_1(%arg0: i32) -> (i32, i32) {
    %c0_i32 = arith.constant 0 : i32
    %c0_i32_0 = arith.constant 0 : i32
    return %arg0, %c0_i32 : i32, i32
  }
  func.func @transform_2(%arg0: i32) -> (i32, i32) {
    %c0_i32 = arith.constant 0 : i32
    %c0_i32_0 = arith.constant 0 : i32
    %c0_i32_1 = arith.constant 0 : i32
    return %c0_i32, %c0_i32_0 : i32, i32
  }
  func.func @transform_3(%arg0: i32) -> (i32, i32) {
    %c0_i32 = arith.constant 0 : i32
    %c0_i32_0 = arith.constant 0 : i32
    %c0_i32_1 = arith.constant 0 : i32
    return %c0_i32, %c0_i32_0 : i32, i32
  }
  func.func @transform_4(%arg0: i32) -> (i32, i32) {
    %c0_i32 = arith.constant 0 : i32
    %c0_i32_0 = arith.constant 0 : i32
    return %arg0, %c0_i32 : i32, i32
  }
}

module attributes {stable_mosaic.version = 11 : i64} {
  func.func @_abs_floor_emb_kernel(%arg0: i32, %arg1: memref<8x1xf32, #tpu.memory_space<vmem>>, %arg2: memref<8x32xf32, #tpu.memory_space<vmem>>, %arg3: memref<32x128xf32, #tpu.memory_space<vmem>>, %arg4: memref<2x128xf32, #tpu.memory_space<vmem>>, %arg5: memref<8x128xf32, #tpu.memory_space<vmem>>) attributes {dimension_semantics = [#tpu.dimension_semantics<parallel>], iteration_bounds = array<i64: 1>, scalar_prefetch = 0 : i64, scratch_operands = 0 : i64, tpu.core_type = #tpu.core_type<tc>, window_params = [{transform_indices = @transform_0, window_bounds = array<i64: 8, 1>}, {transform_indices = @transform_1, window_bounds = array<i64: 8, 32>}, {pipeline_mode = #tpu.pipeline_mode<synchronous>, transform_indices = @transform_2, window_bounds = array<i64: 32, 128>}, {pipeline_mode = #tpu.pipeline_mode<synchronous>, transform_indices = @transform_3, window_bounds = array<i64: 2, 128>}, {transform_indices = @transform_4, window_bounds = array<i64: 8, 128>}]} {
    %c0 = arith.constant 0 : index
    %c0_0 = arith.constant 0 : index
    %0 = vector.load %arg2[%c0, %c0_0] : memref<8x32xf32, #tpu.memory_space<vmem>>, vector<8x32xf32>
    %c0_1 = arith.constant 0 : index
    %c0_2 = arith.constant 0 : index
    %1 = vector.load %arg3[%c0_1, %c0_2] : memref<32x128xf32, #tpu.memory_space<vmem>>, vector<32x128xf32>
    %cst = arith.constant dense<0.000000e+00> : vector<8x128xf32>
    %2 = tpu.matmul %0, %1, %cst {dimension_numbers = #tpu.dot_dimension_numbers<[1], [0], [0], [1], [0, 0, 1, 1], [], []>} : vector<8x32xf32>, vector<32x128xf32>, vector<8x128xf32> -> vector<8x128xf32>
    %c0_3 = arith.constant 0 : index
    %c0_4 = arith.constant 0 : index
    %3 = vector.load %arg4[%c0_3, %c0_4] : memref<2x128xf32, #tpu.memory_space<vmem>>, vector<1x128xf32>
    %c0_5 = arith.constant 0 : index
    %c0_6 = arith.constant 0 : index
    %4 = vector.load %arg1[%c0_5, %c0_6] : memref<8x1xf32, #tpu.memory_space<vmem>>, vector<8x1xf32>
    %c1 = arith.constant 1 : index
    %c0_7 = arith.constant 0 : index
    %5 = vector.load %arg4[%c1, %c0_7] : memref<2x128xf32, #tpu.memory_space<vmem>>, vector<1x128xf32>
    %6 = vector.broadcast %4 : vector<8x1xf32> to vector<8x128xf32>
    %7 = vector.broadcast %5 : vector<1x128xf32> to vector<8x128xf32>
    %8 = arith.mulf %6, %7 : vector<8x128xf32>
    %9 = vector.broadcast %3 : vector<1x128xf32> to vector<8x128xf32>
    %10 = arith.addf %9, %8 : vector<8x128xf32>
    %11 = arith.addf %2, %10 : vector<8x128xf32>
    %c0_8 = arith.constant 0 : index
    %c0_9 = arith.constant 0 : index
    %12 = vector.load %arg5[%c0_8, %c0_9] : memref<8x128xf32, #tpu.memory_space<vmem>>, vector<8x128xf32>
    tpu.vector_store %arg5[%c0_8, %c0_9], %11 {strides = array<i32>} : memref<8x128xf32, #tpu.memory_space<vmem>>, vector<8x128xf32>,
    return
  }
  func.func @transform_0(%arg0: i32) -> (i32, i32) {
    %c0_i32 = arith.constant 0 : i32
    %c0_i32_0 = arith.constant 0 : i32
    return %arg0, %c0_i32 : i32, i32
  }
  func.func @transform_1(%arg0: i32) -> (i32, i32) {
    %c0_i32 = arith.constant 0 : i32
    %c0_i32_0 = arith.constant 0 : i32
    return %arg0, %c0_i32 : i32, i32
  }
  func.func @transform_2(%arg0: i32) -> (i32, i32) {
    %c0_i32 = arith.constant 0 : i32
    %c0_i32_0 = arith.constant 0 : i32
    %c0_i32_1 = arith.constant 0 : i32
    return %c0_i32, %c0_i32_0 : i32, i32
  }
  func.func @transform_3(%arg0: i32) -> (i32, i32) {
    %c0_i32 = arith.constant 0 : i32
    %c0_i32_0 = arith.constant 0 : i32
    %c0_i32_1 = arith.constant 0 : i32
    return %c0_i32, %c0_i32_0 : i32, i32
  }
  func.func @transform_4(%arg0: i32) -> (i32, i32) {
    %c0_i32 = arith.constant 0 : i32
    %c0_i32_0 = arith.constant 0 : i32
    return %arg0, %c0_i32 : i32, i32
  }
}

</mosaic_0001>

<bundles_post_ra>
// kernel: tpu_custom_call.1
= control target key start
LH: loop header
LB: loop body
LE: loop exit
PB: predicated region body
PF: predicated region fallthrough
CT: control target
= control target key end

     0   :  { %9 = vsyncpa [#allocation3], 0  ;;  %s266_s0 = inlined_call_operand.vmem [shape: f32[8,1], index: 0, kind: input, shape index: {}]   ;;  %s267_s1 = inlined_call_operand.vmem [shape: f32[8,32], index: 1, kind: input, shape index: {}]   ;;  %s268_s2 = inlined_call_operand.hbm [shape: f32[32,128], index: 2, kind: input, shape index: {}]   ;;  %s269_s3 = inlined_call_operand.vmem [shape: f32[2,128], index: 3, kind: input, shape index: {}]   ;;  %s270_s4 = inlined_call_operand.hbm [shape: f32[8,128], index: 4, kind: output, shape index: {}]  }
   0x1   :  { %10 = vsyncpa [#allocation4], 0  ;;  %s216_s15 = smov [#allocation2]  }
   0x2   :  { %s20_s16 = sshll.u32 %s216_s15, 4  ;;  %s21_s16 = int_to_ptr.vmem [resolvable:$true] %s20_s16 }
   0x3   :  { %s180_s17 = scalar_lea.vmem %s21_s16, 512  ;;  %p185_p1 = scmp.lt.s32.totalorder %s21_s16, %s21_s16 }
   0x4   :  { %p181_p0 = scmp.ne.s32.totalorder %s21_s16, %s180_s17  ;;  %p186_p2 = scmp.lt.s32.totalorder %s180_s17, %s180_s17 }
   0x6   :  { %p187_p3 = por %p186_p2, %p185_p1 }
   0x8   :  { %p188_p4 = pnand %p187_p3, %p181_p0 }
   0xa   :  { %191 = shalt.err (!%p188_p4)
}
   0xb   :  { %s217_s18 = smov 128   ;;  %s218_s19 = smov 8  }
   0xc   :  { %26 = dma.hbm_to_vmem [thread:$0]  %s268_s2, 512, %s21_s16, [#allocation3], %s217_s18, %s217_s18, %s218_s19  }
   0xd   :  { %212 = dma.done.wait [#allocation3], 512  }
   0xe   :  { %213 = vsyncadd [#allocation3], 4294966784  ;;  %v219_v0 = vmov 0.0   ;;  %vm220_vm0 = vmmov 0   ;;  %v221_v1 = vmov 0   ;;  %v36_v2 = vld [vmem:[#allocation2 + $0x18] sm:$0xff] }
   0xf   :  { %153 = vmatprep.subr.mxu0 %v219_v0  ;;  %161 = vmatprep.mubr.msk.f32.mxu0 %vm220_vm0, %v219_v0  ;;  %v35_v3 = vld [vmem:[#allocation2 + $0x10] sm:$0xff]  ;;  %v38_v4 = vld [vmem:[%s266_s0] sm:$0xff]  ;;  %v34_v5 = vld [vmem:[#allocation2 + $0x8] sm:$0xff]  ;;  %vm55_vm1 = vcmask 261120   ;;  %s222_s28 = smov [#allocation5]  }
  0x10   :  { %171 = vset.pattern.permute.xlu0 %v221_v1  ;;  %154 = vmatpush3.msra.mxu0 %v36_v2  ;;  %v33_v6 = vld [vmem:[#allocation2] sm:$0xff]  ;;  %s136_s29 = sshll.u32 %s222_s28, 4  ;;  %s137_s29 = int_to_ptr.vmem [resolvable:$true] %s136_s29 }
  0x11   :  { %155 = vmatprep.subr.mxu0 %v219_v0  ;;  %42 = vperm.xlu0 %171, %v38_v4   ;;  %v32_v7 = vld [vmem:[%s267_s1] sm:$0xff]  ;;  %s192_s1 = scalar_lea.vmem %s137_s29, 128  ;;  %p197_p6 = scmp.lt.s32.totalorder %s137_s29, %s137_s29 }
  0x12   :  { %156 = vmatpush3.msra.mxu0 %v35_v3  ;;  %v145_v8 = vld [vmem:[%s269_s3 + $0x1] ss:$0 sm:$0xff]  ;;  %v146_v11 = vld [vmem:[%s269_s3] ss:$0 sm:$0xff]  ;;  %p193_p5 = scmp.ne.s32.totalorder %s137_s29, %s192_s1  ;;  %p198_p7 = scmp.lt.s32.totalorder %s192_s1, %s192_s1 }
  0x13   :  { %157 = vmatprep.subr.mxu0 %v219_v0 }
  0x14   :  { %158 = vmatpush3.msra.mxu0 %v34_v5  ;;  %p199_p8 = por %p198_p7, %p197_p6 }
  0x15   :  { %159 = vmatprep.subr.mxu0 %v219_v0 }
  0x16   :  { %160 = vmatpush3.msra.mxu0 %v33_v6  ;;  %p200_p9 = pnand %p199_p8, %p193_p5 }
  0x17   :  { %162 = vmatmul.mubr.msk.f32.vlgmr.msra.gmra.mxu0 %vm55_vm1, %v32_v7 }
  0x8c   :  { %v43_v9 = vpop.permute.xlu0 %42 }
  0x8d   :  { %v49_v10 = vmul.f32 %v145_v8, %v43_v9 }
  0x8f   :  { %v54_v12 = vadd.f32 %v146_v11, %v49_v10 }
  0xd7   :  { %v125_v13 = vpop.f32.mrf.mxu0 }
  0xd8   :  { %v126_v14 = vadd.f32 %v125_v13, %v54_v12 }
  0xd9   :  { %v163_v15 = vpop.f32.mrf.mxu0 }
  0xda   :  { %129 = vst [vmem:[#allocation5] sm:$0xff] %v126_v14 }
  0xdb   :  { %203 = shalt.err (!%p200_p9)
}
  0xdc   :  { %139 = dma.vmem_to_hbm [thread:$0]  %s137_s29, 128, %s270_s4, [#allocation4]  }
  0xdd   :  { %214 = dma.done.wait [#allocation4], 128  }
  0xde   :  { %215 = vsyncadd [#allocation4], 4294967168 }
  0xdf   :  { %143 = vsyncpa [#allocation3], 1 }
  0xe0   :  { %144 = vsyncpa [#allocation4], 1 }

// kernel: tpu_custom_call.1
= control target key start
LH: loop header
LB: loop body
LE: loop exit
PB: predicated region body
PF: predicated region fallthrough
CT: control target
= control target key end

     0   :  { %9 = vsyncpa [#allocation3], 0  ;;  %s266_s0 = inlined_call_operand.vmem [shape: f32[8,1], index: 0, kind: input, shape index: {}]   ;;  %s267_s1 = inlined_call_operand.vmem [shape: f32[8,32], index: 1, kind: input, shape index: {}]   ;;  %s268_s2 = inlined_call_operand.hbm [shape: f32[32,128], index: 2, kind: input, shape index: {}]   ;;  %s269_s3 = inlined_call_operand.vmem [shape: f32[2,128], index: 3, kind: input, shape index: {}]   ;;  %s270_s4 = inlined_call_operand.hbm [shape: f32[8,128], index: 4, kind: output, shape index: {}]  }
   0x1   :  { %10 = vsyncpa [#allocation4], 0  ;;  %s216_s15 = smov [#allocation2]  }
   0x2   :  { %s20_s16 = sshll.u32 %s216_s15, 4  ;;  %s21_s16 = int_to_ptr.vmem [resolvable:$true] %s20_s16 }
   0x3   :  { %s180_s17 = scalar_lea.vmem %s21_s16, 512  ;;  %p185_p1 = scmp.lt.s32.totalorder %s21_s16, %s21_s16 }
   0x4   :  { %p181_p0 = scmp.ne.s32.totalorder %s21_s16, %s180_s17  ;;  %p186_p2 = scmp.lt.s32.totalorder %s180_s17, %s180_s17 }
   0x6   :  { %p187_p3 = por %p186_p2, %p185_p1 }
   0x8   :  { %p188_p4 = pnand %p187_p3, %p181_p0 }
   0xa   :  { %191 = shalt.err (!%p188_p4)
}
   0xb   :  { %s217_s18 = smov 128   ;;  %s218_s19 = smov 8  }
   0xc   :  { %26 = dma.hbm_to_vmem [thread:$0]  %s268_s2, 512, %s21_s16, [#allocation3], %s217_s18, %s217_s18, %s218_s19  }
   0xd   :  { %212 = dma.done.wait [#allocation3], 512  }
   0xe   :  { %213 = vsyncadd [#allocation3], 4294966784  ;;  %v219_v0 = vmov 0.0   ;;  %vm220_vm0 = vmmov 0   ;;  %v221_v1 = vmov 0   ;;  %v36_v2 = vld [vmem:[#allocation2 + $0x18] sm:$0xff] }
   0xf   :  { %153 = vmatprep.subr.mxu0 %v219_v0  ;;  %161 = vmatprep.mubr.msk.f32.mxu0 %vm220_vm0, %v219_v0  ;;  %v35_v3 = vld [vmem:[#allocation2 + $0x10] sm:$0xff]  ;;  %v38_v4 = vld [vmem:[%s266_s0] sm:$0xff]  ;;  %v34_v5 = vld [vmem:[#allocation2 + $0x8] sm:$0xff]  ;;  %vm55_vm1 = vcmask 261120   ;;  %s222_s28 = smov [#allocation5]  }
  0x10   :  { %171 = vset.pattern.permute.xlu0 %v221_v1  ;;  %154 = vmatpush3.msra.mxu0 %v36_v2  ;;  %v33_v6 = vld [vmem:[#allocation2] sm:$0xff]  ;;  %s136_s29 = sshll.u32 %s222_s28, 4  ;;  %s137_s29 = int_to_ptr.vmem [resolvable:$true] %s136_s29 }
  0x11   :  { %155 = vmatprep.subr.mxu0 %v219_v0  ;;  %42 = vperm.xlu0 %171, %v38_v4   ;;  %v32_v7 = vld [vmem:[%s267_s1] sm:$0xff]  ;;  %s192_s1 = scalar_lea.vmem %s137_s29, 128  ;;  %p197_p6 = scmp.lt.s32.totalorder %s137_s29, %s137_s29 }
  0x12   :  { %156 = vmatpush3.msra.mxu0 %v35_v3  ;;  %v145_v8 = vld [vmem:[%s269_s3 + $0x1] ss:$0 sm:$0xff]  ;;  %v146_v11 = vld [vmem:[%s269_s3] ss:$0 sm:$0xff]  ;;  %p193_p5 = scmp.ne.s32.totalorder %s137_s29, %s192_s1  ;;  %p198_p7 = scmp.lt.s32.totalorder %s192_s1, %s192_s1 }
  0x13   :  { %157 = vmatprep.subr.mxu0 %v219_v0 }
  0x14   :  { %158 = vmatpush3.msra.mxu0 %v34_v5  ;;  %p199_p8 = por %p198_p7, %p197_p6 }
  0x15   :  { %159 = vmatprep.subr.mxu0 %v219_v0 }
  0x16   :  { %160 = vmatpush3.msra.mxu0 %v33_v6  ;;  %p200_p9 = pnand %p199_p8, %p193_p5 }
  0x17   :  { %162 = vmatmul.mubr.msk.f32.vlgmr.msra.gmra.mxu0 %vm55_vm1, %v32_v7 }
  0x8c   :  { %v43_v9 = vpop.permute.xlu0 %42 }
  0x8d   :  { %v49_v10 = vmul.f32 %v145_v8, %v43_v9 }
  0x8f   :  { %v54_v12 = vadd.f32 %v146_v11, %v49_v10 }
  0xd7   :  { %v125_v13 = vpop.f32.mrf.mxu0 }
  0xd8   :  { %v126_v14 = vadd.f32 %v125_v13, %v54_v12 }
  0xd9   :  { %v163_v15 = vpop.f32.mrf.mxu0 }
  0xda   :  { %129 = vst [vmem:[#allocation5] sm:$0xff] %v126_v14 }
  0xdb   :  { %203 = shalt.err (!%p200_p9)
}
  0xdc   :  { %139 = dma.vmem_to_hbm [thread:$0]  %s137_s29, 128, %s270_s4, [#allocation4]  }
  0xdd   :  { %214 = dma.done.wait [#allocation4], 128  }
  0xde   :  { %215 = vsyncadd [#allocation4], 4294967168 }
  0xdf   :  { %143 = vsyncpa [#allocation3], 1 }
  0xe0   :  { %144 = vsyncpa [#allocation4], 1 }

</bundles_post_ra>
